<compile_context>
chip_gen: v7x
topology: tpu7x:2x2x1
jax: 0.10.0
libtpu: 0.0.40
codegen_flags: <defaults>
</compile_context>

<pallas_src>
import functools

import jax
import jax.numpy as jnp
import numpy as np
from jax.experimental import pallas as pl
from jax.experimental.pallas import tpu as pltpu  # noqa: F401  (TPU backend assumed)

HIDDEN = 256           # nn.LSTM(hidden_size=256)
ENV = 8                # env_num (batch)
HEAD = 20              # non-image features
IMG = 256              # 16 x 16 image, flattened
POOL = 128             # 8 channels * 4 * 4 after MaxPool2d(2,2)
FCO = 10               # fc1 output width
GK = 32                # packed LSTM LHS width: [head 20 | bias-one 1 | fc 10 | pad 1]
FC_OFF = HEAD + 1      # fc features live in lanes 21..30 of the packed LHS
NG = 3 * HIDDEN        # gate columns kept: [i | g | o]; forget gate dropped (c0 == 0)


# ---------------------------------------------------------------------------
# Fused Pallas kernel
# ---------------------------------------------------------------------------
def _sigmoid(v):
    # exp runs on the EUP; approx=True makes the reciprocal a single EUP vrcp
    # instead of a VALU divide/Newton sequence.
    return pl.reciprocal(1.0 + jnp.exp(-v), approx=True)


def _memory_cnn_kernel(head_ref, img_ref, wconv_ref, wfc_ref, wg_ref, h_ref):
    """conv stack (one affine map) + maxpool + fc1/tanh + zero-state LSTM step."""
    # conv1∘conv2∘conv3 folded offline into a single (256, 512) affine map whose
    # output columns are four NCHW-flat 128-lane pooling slabs.  bf16 MXU operands,
    # f32 accumulation.  K stays exactly 256; bias is one VPU add.
    conv = (jnp.dot(img_ref[...], wconv_ref[:IMG, :],
                    preferred_element_type=jnp.float32)
            + wconv_ref[IMG:IMG + 1, :].astype(jnp.float32))              # (B, 512)

    # MaxPool2d(2, 2): elementwise max of the four lane-aligned 128-wide slabs.
    pooled = jnp.maximum(
        jnp.maximum(conv[:, 0:POOL], conv[:, POOL:2 * POOL]),
        jnp.maximum(conv[:, 2 * POOL:3 * POOL], conv[:, 3 * POOL:4 * POOL]))  # (B, 128)

    # fc1 + tanh, emitted directly into lanes FC_OFF..FC_OFF+9 of a 32-wide tile.
    # All other lanes have zero weight and zero bias -> exactly tanh(0) = 0, so the
    # LSTM LHS below is a plain add (no concat / roll).  K stays exactly 128.
    fc = jnp.tanh(jnp.dot(pooled.astype(jnp.bfloat16), wfc_ref[:POOL, :],
                          preferred_element_type=jnp.float32)
                  + wfc_ref[POOL:POOL + 1, :].astype(jnp.float32))        # (B, 32)

    # Single K=32 gate matmul.  LHS = [head | 1 | fc | 0]; bih+bhh is row 20 of the
    # packed weight (picked up by the ones lane), so no second dot and no broadcast
    # bias add.  h0 == 0, so W_hh (and its 1 MiB DMA) is dropped entirely.
    lhs = (head_ref[...] + fc).astype(jnp.bfloat16)                       # (B, 32)
    gates = jnp.dot(lhs, wg_ref[...], preferred_element_type=jnp.float32)  # (B, 768)

    i = _sigmoid(gates[:, 0:HIDDEN])
    g = jnp.tanh(gates[:, HIDDEN:2 * HIDDEN])
    o = _sigmoid(gates[:, 2 * HIDDEN:3 * HIDDEN])
    # Zero initial cell state: c1 = f*c0 + i*g == i*g, so f is never computed.
    h_ref[...] = o * jnp.tanh(i * g)


def memory_cnn_forward(fused, x):
    """x: (B, 276) = [head 20 | 16x16 image 256].  Returns (1, B, HIDDEN)."""
    B = x.shape[0]
    # head slice starts at lane 0 (aligned); ones column at lane 20 folds the LSTM
    # bias into the single gate matmul; lanes 21..31 stay 0 so the kernel can
    # lane-pack fc with a plain add.
    head_aug = jnp.concatenate(
        [x[:, :HEAD], jnp.ones((B, 1), jnp.float32),
         jnp.zeros((B, GK - HEAD - 1), jnp.float32)], axis=1)             # (B, 32) f32
    # The 20-offset slice needs a copy anyway because of the bf16 cast; XLA fuses it.
    img = x[:, HEAD:].astype(jnp.bfloat16)                                # (B, 256) bf16

    flops = 2 * B * (IMG * 4 * POOL + POOL * GK + GK * NG)
    transcendentals = B * (4 * HIDDEN + GK)
    bytes_accessed = (2 * ((IMG + 1) * 4 * POOL + (POOL + 1) * GK + GK * NG)  # bf16 weights
                      + 4 * B * GK + 2 * B * IMG + 4 * B * HIDDEN)            # activations

    h1 = pl.pallas_call(
        _memory_cnn_kernel,
        out_shape=jax.ShapeDtypeStruct((B, HIDDEN), jnp.float32),
        grid=(1,),
        in_specs=[
            pl.BlockSpec((B, GK), lambda i: (0, 0)),
            pl.BlockSpec((B, IMG), lambda i: (0, 0)),
            pl.BlockSpec((IMG + 1, 4 * POOL), lambda i: (0, 0)),
            pl.BlockSpec((POOL + 1, GK), lambda i: (0, 0)),
            pl.BlockSpec((GK, NG), lambda i: (0, 0)),
        ],
        out_specs=pl.BlockSpec((B, HIDDEN), lambda i: (0, 0)),
        cost_estimate=pl.CostEstimate(
            flops=flops, transcendentals=transcendentals,
            bytes_accessed=bytes_accessed),
    )(head_aug, img, fused['w_conv'], fused['w_fc'], fused['w_gates'])
    return h1[None]                                   # (1, B, HIDDEN), LSTM out (seq=1)


# ---------------------------------------------------------------------------
# Offline weight folding (numpy float64) + parameter init
# ---------------------------------------------------------------------------
def _conv2d_np(x, w, b):
    """Valid conv; NHWC activations, torch-layout (Cout,Cin,kh,kw) weights; float64."""
    cout, cin, kh, kw = w.shape
    n, hh, ww, _ = x.shape
    ho, wo = hh - kh + 1, ww - kw + 1
    cols = [x[:, dh:dh + ho, dw:dw + wo, :] for dh in range(kh) for dw in range(kw)]
    patches = np.stack(cols, axis=3).reshape(n * ho * wo, kh * kw * cin)
    wm = w.transpose(2, 3, 1, 0).reshape(kh * kw * cin, cout)
    return (patches @ wm + b).reshape(n, ho, wo, cout)


def build_fused_params(params):
    """Fold conv stack (pool-friendly columns), fc1 (lane-packed) and LSTM weights (bf16)."""
    p = {k: np.asarray(v, np.float64) for k, v in params.items()}

    def conv_stack(x, with_bias):
        for name in ('conv1', 'conv2', 'conv3'):
            b = p[name + '_b'] if with_bias else np.zeros_like(p[name + '_b'])
            x = _conv2d_np(x, p[name + '_w'], b)
        return x                                                   # (N, 8, 8, 8) NHWC

    # Linear part: conv stack on the 256 basis images; bias: conv stack of zeros.
    lin = conv_stack(np.eye(IMG).reshape(IMG, 16, 16, 1), with_bias=False)   # (256,8,8,8)
    bias = conv_stack(np.zeros((1, 16, 16, 1)), with_bias=True)              # (1,8,8,8)

    def pool_slabs(y):
        """(N,8,8,8) -> (N,512): four 128-lane slabs (one per 2x2 pool offset),
        each flattened in torch NCHW order (c*16 + h*4 + w)."""
        n = y.shape[0]
        parts = [np.transpose(y[:, dh::2, dw::2, :], (0, 3, 1, 2)).reshape(n, POOL)
                 for dh in (0, 1) for dw in (0, 1)]
        return np.concatenate(parts, axis=1)

    w_conv = np.concatenate([pool_slabs(lin), pool_slabs(bias)], axis=0)     # (257, 512)

    # fc1 packed to 32 output lanes: real outputs at lanes FC_OFF..FC_OFF+9, zeros
    # elsewhere so tanh of those lanes is exactly 0 (enables the add-based concat).
    w_fc = np.zeros((POOL + 1, GK))
    w_fc[:POOL, FC_OFF:FC_OFF + FCO] = p['fc1_w'].T
    w_fc[POOL, FC_OFF:FC_OFF + FCO] = p['fc1_b']

    # LSTM input weights, forget-gate columns dropped (c0 == 0); gate column order
    # [i | g | o].  Row 20 carries bih+bhh (matched to the ones lane of the LHS);
    # row 31 is padding.  weight_hh is intentionally absent (h0 == 0).
    wih_t = p['wih'].T                                                       # (30, 4H)
    sel = np.concatenate([np.arange(0, HIDDEN), np.arange(2 * HIDDEN, 4 * HIDDEN)])
    w_gates = np.zeros((GK, NG))
    w_gates[:HEAD] = wih_t[:HEAD][:, sel]
    w_gates[HEAD] = (p['bih'] + p['bhh'])[sel]
    w_gates[FC_OFF:FC_OFF + FCO] = wih_t[HEAD:][:, sel]

    bf16 = lambda a: jnp.asarray(a, jnp.bfloat16)    # bf16 MXU operands (f32 accumulate)
    return dict(w_conv=bf16(w_conv), w_fc=bf16(w_fc), w_gates=bf16(w_gates))


def init_params(key):
    keys = jax.random.split(key, 12)

    def u(k, shape, fan_in):
        bound = 1.0 / np.sqrt(fan_in)
        return jax.random.uniform(k, shape, jnp.float32, -bound, bound)

    return dict(
        conv1_w=u(keys[0], (4, 1, 3, 3), 1 * 3 * 3),
        conv1_b=u(keys[1], (4,), 1 * 3 * 3),
        conv2_w=u(keys[2], (8, 4, 4, 4), 4 * 4 * 4),
        conv2_b=u(keys[3], (8,), 4 * 4 * 4),
        conv3_w=u(keys[4], (8, 8, 4, 4), 8 * 4 * 4),
        conv3_b=u(keys[5], (8,), 8 * 4 * 4),
        fc1_w=u(keys[6], (10, 8 * 4 * 4), 8 * 4 * 4),
        fc1_b=u(keys[7], (10,), 8 * 4 * 4),
        wih=u(keys[8], (4 * HIDDEN, 30), HIDDEN),      # PyTorch weight_ih_l0
        whh=u(keys[9], (4 * HIDDEN, HIDDEN), HIDDEN),  # PyTorch weight_hh_l0 (ref only)
        bih=u(keys[10], (4 * HIDDEN,), HIDDEN),
        bhh=u(keys[11], (4 * HIDDEN,), HIDDEN),
    )


# ---------------------------------------------------------------------------
# Pure-JAX reference mirroring the PyTorch forward (masks=None path)
# ---------------------------------------------------------------------------
def reference_forward(params, x):
    B = x.shape[0]
    hi = jax.lax.Precision.HIGHEST
    head = x[:, :HEAD]
    img = x[:, HEAD:].reshape(B, 1, 16, 16)                       # NCHW, like torch

    def conv(v, w, b):
        y = jax.lax.conv_general_dilated(
            v, w, window_strides=(1, 1), padding='VALID',
            dimension_numbers=('NCHW', 'OIHW', 'NCHW'), precision=hi)
        return y + b[None, :, None, None]

    y = conv(img, params['conv1_w'], params['conv1_b'])           # (B, 4, 14, 14)
    y = conv(y, params['conv2_w'], params['conv2_b'])             # (B, 8, 11, 11)
    y = conv(y, params['conv3_w'], params['conv3_b'])             # (B, 8, 8, 8)
    y = y.reshape(B, 8, 4, 2, 4, 2).max(axis=(3, 5))              # MaxPool2d(2, 2)
    flat = y.reshape(B, POOL)                                     # torch.flatten(x, 1)
    fc = jnp.tanh(jnp.dot(flat, params['fc1_w'].T, precision=hi) + params['fc1_b'])

    inp = jnp.concatenate([head, fc], axis=1)                     # (B, 30)
    h0 = jnp.zeros((B, HIDDEN), jnp.float32)
    c0 = jnp.zeros((B, HIDDEN), jnp.float32)
    gates = (jnp.dot(inp, params['wih'].T, precision=hi)
             + jnp.dot(h0, params['whh'].T, precision=hi)
             + params['bih'] + params['bhh'])
    i = jax.nn.sigmoid(gates[:, 0:HIDDEN])
    f = jax.nn.sigmoid(gates[:, HIDDEN:2 * HIDDEN])
    g = jnp.tanh(gates[:, 2 * HIDDEN:3 * HIDDEN])
    o = jax.nn.sigmoid(gates[:, 3 * HIDDEN:4 * HIDDEN])
    c1 = f * c0 + i * g
    return (o * jnp.tanh(c1))[None]                               # (1, B, HIDDEN)


if __name__ == "__main__":
    key = jax.random.PRNGKey(0)
    pkey, xkey = jax.random.split(key)
    params = init_params(pkey)
    fused = build_fused_params(params)
    x = jax.random.normal(xkey, (ENV, HEAD + IMG), jnp.float32)

    fwd = jax.jit(functools.partial(memory_cnn_forward, fused))
    out = jax.block_until_ready(fwd(x))

    ref = reference_forward(params, x)
    assert out.shape == (1, ENV, HIDDEN), out.shape
    # Tolerance covers the conv-fold reassociation plus bf16 MXU-operand rounding
    # (f32 accumulation) vs. the f32 HIGHEST-precision XLA reference.
    np.testing.assert_allclose(np.asarray(out), np.asarray(ref), atol=2e-2, rtol=2e-2)
    print("KERNEL_OK")
</pallas_src>

<mosaic_0001>
module attributes {stable_mosaic.version = 11 : i64} {
  func.func @_memory_cnn_kernel(%arg0: i32, %arg1: memref<8x32xf32, #tpu.memory_space<vmem>>, %arg2: memref<8x256xbf16, #tpu.memory_space<vmem>>, %arg3: memref<257x512xbf16, #tpu.memory_space<vmem>>, %arg4: memref<129x32xbf16, #tpu.memory_space<vmem>>, %arg5: memref<32x768xbf16, #tpu.memory_space<vmem>>, %arg6: memref<8x256xf32, #tpu.memory_space<vmem>>) attributes {dimension_semantics = [#tpu.dimension_semantics<arbitrary>], iteration_bounds = array<i64: 1>, scalar_prefetch = 0 : i64, scratch_operands = 0 : i64, tpu.core_type = #tpu.core_type<tc>, window_params = [{pipeline_mode = #tpu.pipeline_mode<synchronous>, transform_indices = @transform_0, window_bounds = array<i64: 8, 32>}, {pipeline_mode = #tpu.pipeline_mode<synchronous>, transform_indices = @transform_1, window_bounds = array<i64: 8, 256>}, {pipeline_mode = #tpu.pipeline_mode<synchronous>, transform_indices = @transform_2, window_bounds = array<i64: 257, 512>}, {pipeline_mode = #tpu.pipeline_mode<synchronous>, transform_indices = @transform_3, window_bounds = array<i64: 129, 32>}, {pipeline_mode = #tpu.pipeline_mode<synchronous>, transform_indices = @transform_4, window_bounds = array<i64: 32, 768>}, {pipeline_mode = #tpu.pipeline_mode<synchronous>, transform_indices = @transform_5, window_bounds = array<i64: 8, 256>}]} {
    %c0 = arith.constant 0 : index
    %c0_0 = arith.constant 0 : index
    %0 = vector.load %arg2[%c0, %c0_0] : memref<8x256xbf16, #tpu.memory_space<vmem>>, vector<8x256xbf16>
    %c0_1 = arith.constant 0 : index
    %c0_2 = arith.constant 0 : index
    %1 = vector.load %arg3[%c0_1, %c0_2] : memref<257x512xbf16, #tpu.memory_space<vmem>>, vector<256x512xbf16>
    %cst = arith.constant dense<0.000000e+00> : vector<8x512xf32>
    %2 = tpu.matmul %0, %1, %cst {dimension_numbers = #tpu.dot_dimension_numbers<[1], [0], [0], [1], [0, 0, 1, 1], [], []>} : vector<8x256xbf16>, vector<256x512xbf16>, vector<8x512xf32> -> vector<8x512xf32>
    %c256 = arith.constant 256 : index
    %c0_3 = arith.constant 0 : index
    %3 = vector.load %arg3[%c256, %c0_3] : memref<257x512xbf16, #tpu.memory_space<vmem>>, vector<1x512xbf16>
    %4 = arith.extf %3 : vector<1x512xbf16> to vector<1x512xf32>
    %5 = vector.broadcast %4 : vector<1x512xf32> to vector<8x512xf32>
    %6 = arith.addf %2, %5 : vector<8x512xf32>
    %7 = vector.extract_strided_slice %6 {offsets = [0, 0], sizes = [8, 128], strides = [1, 1]} : vector<8x512xf32> to vector<8x128xf32>
    %8 = vector.extract_strided_slice %6 {offsets = [0, 128], sizes = [8, 128], strides = [1, 1]} : vector<8x512xf32> to vector<8x128xf32>
    %9 = arith.maximumf %7, %8 : vector<8x128xf32>
    %10 = vector.extract_strided_slice %6 {offsets = [0, 256], sizes = [8, 128], strides = [1, 1]} : vector<8x512xf32> to vector<8x128xf32>
    %11 = vector.extract_strided_slice %6 {offsets = [0, 384], sizes = [8, 128], strides = [1, 1]} : vector<8x512xf32> to vector<8x128xf32>
    %12 = arith.maximumf %10, %11 : vector<8x128xf32>
    %13 = arith.maximumf %9, %12 : vector<8x128xf32>
    %14 = arith.truncf %13 : vector<8x128xf32> to vector<8x128xbf16>
    %c0_4 = arith.constant 0 : index
    %c0_5 = arith.constant 0 : index
    %15 = vector.load %arg4[%c0_4, %c0_5] : memref<129x32xbf16, #tpu.memory_space<vmem>>, vector<128x32xbf16>
    %cst_6 = arith.constant dense<0.000000e+00> : vector<8x32xf32>
    %16 = tpu.matmul %14, %15, %cst_6 {dimension_numbers = #tpu.dot_dimension_numbers<[1], [0], [0], [1], [0, 0, 1, 1], [], []>} : vector<8x128xbf16>, vector<128x32xbf16>, vector<8x32xf32> -> vector<8x32xf32>
    %c128 = arith.constant 128 : index
    %c0_7 = arith.constant 0 : index
    %17 = vector.load %arg4[%c128, %c0_7] : memref<129x32xbf16, #tpu.memory_space<vmem>>, vector<1x32xbf16>
    %18 = arith.extf %17 : vector<1x32xbf16> to vector<1x32xf32>
    %19 = vector.broadcast %18 : vector<1x32xf32> to vector<8x32xf32>
    %20 = arith.addf %16, %19 : vector<8x32xf32>
    %21 = math.tanh %20 : vector<8x32xf32>
    %c0_8 = arith.constant 0 : index
    %c0_9 = arith.constant 0 : index
    %22 = vector.load %arg1[%c0_8, %c0_9] : memref<8x32xf32, #tpu.memory_space<vmem>>, vector<8x32xf32>
    %23 = arith.addf %22, %21 : vector<8x32xf32>
    %24 = arith.truncf %23 : vector<8x32xf32> to vector<8x32xbf16>
    %c0_10 = arith.constant 0 : index
    %c0_11 = arith.constant 0 : index
    %25 = vector.load %arg5[%c0_10, %c0_11] : memref<32x768xbf16, #tpu.memory_space<vmem>>, vector<32x768xbf16>
    %cst_12 = arith.constant dense<0.000000e+00> : vector<8x768xf32>
    %26 = tpu.matmul %24, %25, %cst_12 {dimension_numbers = #tpu.dot_dimension_numbers<[1], [0], [0], [1], [0, 0, 1, 1], [], []>} : vector<8x32xbf16>, vector<32x768xbf16>, vector<8x768xf32> -> vector<8x768xf32>
    %27 = vector.extract_strided_slice %26 {offsets = [0, 0], sizes = [8, 256], strides = [1, 1]} : vector<8x768xf32> to vector<8x256xf32>
    %cst_13 = arith.constant 0.000000e+00 : f32
    %28 = vector.broadcast %cst_13 : f32 to vector<8x256xf32>
    %29 = arith.subf %28, %27 : vector<8x256xf32>
    %30 = math.exp %29 : vector<8x256xf32>
    %cst_14 = arith.constant 1.000000e+00 : f32
    %31 = vector.broadcast %cst_14 : f32 to vector<8x256xf32>
    %32 = arith.addf %31, %30 : vector<8x256xf32>
    %33 = tpu.reciprocal %32 {approx = true} : vector<8x256xf32> -> vector<8x256xf32>
    %34 = vector.extract_strided_slice %26 {offsets = [0, 256], sizes = [8, 256], strides = [1, 1]} : vector<8x768xf32> to vector<8x256xf32>
    %35 = math.tanh %34 : vector<8x256xf32>
    %36 = vector.extract_strided_slice %26 {offsets = [0, 512], sizes = [8, 256], strides = [1, 1]} : vector<8x768xf32> to vector<8x256xf32>
    %cst_15 = arith.constant 0.000000e+00 : f32
    %37 = vector.broadcast %cst_15 : f32 to vector<8x256xf32>
    %38 = arith.subf %37, %36 : vector<8x256xf32>
    %39 = math.exp %38 : vector<8x256xf32>
    %cst_16 = arith.constant 1.000000e+00 : f32
    %40 = vector.broadcast %cst_16 : f32 to vector<8x256xf32>
    %41 = arith.addf %40, %39 : vector<8x256xf32>
    %42 = tpu.reciprocal %41 {approx = true} : vector<8x256xf32> -> vector<8x256xf32>
    %43 = arith.mulf %33, %35 : vector<8x256xf32>
    %44 = math.tanh %43 : vector<8x256xf32>
    %45 = arith.mulf %42, %44 : vector<8x256xf32>
    %c0_17 = arith.constant 0 : index
    %c0_18 = arith.constant 0 : index
    %46 = vector.load %arg6[%c0_17, %c0_18] : memref<8x256xf32, #tpu.memory_space<vmem>>, vector<8x256xf32>
    tpu.vector_store %arg6[%c0_17, %c0_18], %45 {strides = array<i32>} : memref<8x256xf32, #tpu.memory_space<vmem>>, vector<8x256xf32>,
    return
  }
  func.func @transform_0(%arg0: i32) -> (i32, i32) {
    %c0_i32 = arith.constant 0 : i32
    %c0_i32_0 = arith.constant 0 : i32
    %c0_i32_1 = arith.constant 0 : i32
    return %c0_i32, %c0_i32_0 : i32, i32
  }
  func.func @transform_1(%arg0: i32) -> (i32, i32) {
    %c0_i32 = arith.constant 0 : i32
    %c0_i32_0 = arith.constant 0 : i32
    %c0_i32_1 = arith.constant 0 : i32
    return %c0_i32, %c0_i32_0 : i32, i32
  }
  func.func @transform_2(%arg0: i32) -> (i32, i32) {
    %c0_i32 = arith.constant 0 : i32
    %c0_i32_0 = arith.constant 0 : i32
    %c0_i32_1 = arith.constant 0 : i32
    return %c0_i32, %c0_i32_0 : i32, i32
  }
  func.func @transform_3(%arg0: i32) -> (i32, i32) {
    %c0_i32 = arith.constant 0 : i32
    %c0_i32_0 = arith.constant 0 : i32
    %c0_i32_1 = arith.constant 0 : i32
    return %c0_i32, %c0_i32_0 : i32, i32
  }
  func.func @transform_4(%arg0: i32) -> (i32, i32) {
    %c0_i32 = arith.constant 0 : i32
    %c0_i32_0 = arith.constant 0 : i32
    %c0_i32_1 = arith.constant 0 : i32
    return %c0_i32, %c0_i32_0 : i32, i32
  }
  func.func @transform_5(%arg0: i32) -> (i32, i32) {
    %c0_i32 = arith.constant 0 : i32
    %c0_i32_0 = arith.constant 0 : i32
    %c0_i32_1 = arith.constant 0 : i32
    return %c0_i32, %c0_i32_0 : i32, i32
  }
}

</mosaic_0001>

<bundles_post_ra>
// kernel: memory_cnn_forward.1
= control target key start
LH: loop header
LB: loop body
LE: loop exit
PB: predicated region body
PF: predicated region fallthrough
CT: control target
= control target key end

     0   :  { %10 = vsyncpa [#allocation3], 0  ;;  %s1350_s0 = inlined_call_operand.vmem [shape: f32[8,32], index: 0, kind: input, shape index: {}]   ;;  %s1351_s1 = inlined_call_operand.vmem [shape: bf16[8,256], index: 1, kind: input, shape index: {}]   ;;  %s1352_s2 = inlined_call_operand.hbm [shape: bf16[257,512], index: 2, kind: input, shape index: {}]   ;;  %s1353_s3 = inlined_call_operand.vmem [shape: bf16[129,32], index: 3, kind: input, shape index: {}]   ;;  %s1354_s4 = inlined_call_operand.vmem [shape: bf16[32,768], index: 4, kind: input, shape index: {}]   ;;  %s1355_s5 = inlined_call_operand.hbm [shape: f32[8,256], index: 5, kind: output, shape index: {}]  }
   0x1   :  { %11 = vsyncpa [#allocation4], 0  ;;  %s1217_s18 = smov [#allocation2]   ;;  %s1169_s22 = scalar_lea.hbm %s1352_s2, 8448 }
   0x2   :  { %s21_s19 = sshll.u32 %s1217_s18, 4  ;;  %p1170_p0 = scmp.ne.s32.totalorder %s1352_s2, %s1169_s22  ;;  %s22_s19 = int_to_ptr.vmem [resolvable:$true] %s21_s19 }
   0x3   :  { %p1173_p1 = scmp.lt.u32.totalorder %s1169_s22, %s1352_s2 }
   0x5   :  { %p1175_p2 = pnand %p1173_p1, %p1170_p0 }
   0x7   :  { %1178 = shalt.err (!%p1175_p2)
}
   0x8   :  { %s1179_s27 = scalar_lea.vmem %s22_s19, 8448  ;;  %p1184_p4 = scmp.lt.s32.totalorder %s22_s19, %s22_s19 }
   0x9   :  { %p1180_p3 = scmp.ne.s32.totalorder %s22_s19, %s1179_s27  ;;  %p1185_p5 = scmp.lt.s32.totalorder %s1179_s27, %s1179_s27 }
   0xb   :  { %p1186_p6 = por %p1185_p5, %p1184_p4 }
   0xd   :  { %p1187_p7 = pnand %p1186_p6, %p1180_p3 }
   0xf   :  { %1190 = shalt.err (!%p1187_p7)
}
  0x10   :  { %s1218_s28 = smov 256   ;;  %s1219_s29 = smov 16  }
  0x11   :  { %27 = dma.hbm_to_vmem [thread:$0]  %s1352_s2, 8448, %s22_s19, [#allocation3], %s1218_s28, %s1218_s28, %s1219_s29  }
  0x12   :  { %1213 = dma.done.wait [#allocation3], 8448  }
  0x13   :  { %1214 = vsyncadd [#allocation3], 4294958848  ;;  %v1019_v0 = vld [vmem:[#allocation2 + $0x4] ss:$16 sps:$4 sm:$0xff]   ;;  %v1021_v1 = vld [vmem:[#allocation2 + $0xc] ss:$16 sps:$4 sm:$0xff]  }
  0x14   :  { %450 = vmatprep.subr.bf16.mxu0 %v1019_v0  ;;  %v1023_v2 = vld [vmem:[#allocation2] ss:$16 sps:$4 sm:$0xff]   ;;  %v1024_v3 = vld [vmem:[#allocation2 + $0x8] ss:$16 sps:$4 sm:$0xff]   ;;  %491 = vmatprep.subr.bf16.mxu1 %v1021_v1  ;;  %v1025_v4 = vld [vmem:[#allocation2 + $0x24] ss:$16 sps:$4 sm:$0xff]  }
  0x15   :  { %451 = vmatpush1.bf16.msra.mxu0 %v1023_v2  ;;  %492 = vmatpush1.bf16.msra.mxu1 %v1024_v3  ;;  %v1027_v5 = vld [vmem:[#allocation2 + $0x2c] ss:$16 sps:$4 sm:$0xff]   ;;  %v1029_v6 = vld [vmem:[#allocation2 + $0x20] ss:$16 sps:$4 sm:$0xff]   ;;  %v1030_v7 = vld [vmem:[#allocation2 + $0x28] ss:$16 sps:$4 sm:$0xff]  }
  0x16   :  { %452 = vmatprep.subr.bf16.mxu0 %v1025_v4  ;;  %493 = vmatprep.subr.bf16.mxu1 %v1027_v5  ;;  %v1031_v8 = vld [vmem:[#allocation2 + $0x44] ss:$16 sps:$4 sm:$0xff]   ;;  %v1033_v9 = vld [vmem:[#allocation2 + $0x4c] ss:$16 sps:$4 sm:$0xff]   ;;  %v1035_v10 = vld [vmem:[#allocation2 + $0x40] ss:$16 sps:$4 sm:$0xff]  }
  0x17   :  { %v1036_v11 = vld [vmem:[#allocation2 + $0x48] ss:$16 sps:$4 sm:$0xff]   ;;  %v1037_v12 = vld [vmem:[#allocation2 + $0x64] ss:$16 sps:$4 sm:$0xff]   ;;  %v1039_v13 = vld [vmem:[#allocation2 + $0x6c] ss:$16 sps:$4 sm:$0xff]  }
  0x18   :  { %v1041_v14 = vld [vmem:[#allocation2 + $0x60] ss:$16 sps:$4 sm:$0xff]   ;;  %v1042_v15 = vld [vmem:[#allocation2 + $0x68] ss:$16 sps:$4 sm:$0xff]   ;;  %v1043_v16 = vld [vmem:[#allocation2 + $0x84] ss:$16 sps:$4 sm:$0xff]  }
  0x19   :  { %453 = vmatpush1.bf16.msra.mxu0 %v1029_v6  ;;  %494 = vmatpush1.bf16.msra.mxu1 %v1030_v7  ;;  %v1045_v17 = vld [vmem:[#allocation2 + $0x8c] ss:$16 sps:$4 sm:$0xff]   ;;  %v1047_v18 = vld [vmem:[#allocation2 + $0x80] ss:$16 sps:$4 sm:$0xff]   ;;  %v1048_v19 = vld [vmem:[#allocation2 + $0x88] ss:$16 sps:$4 sm:$0xff]  }
  0x1a   :  { %454 = vmatprep.subr.bf16.mxu0 %v1031_v8  ;;  %495 = vmatprep.subr.bf16.mxu1 %v1033_v9  ;;  %v1049_v20 = vld [vmem:[#allocation2 + $0xa4] ss:$16 sps:$4 sm:$0xff]   ;;  %v1051_v21 = vld [vmem:[#allocation2 + $0xac] ss:$16 sps:$4 sm:$0xff]   ;;  %v1053_v22 = vld [vmem:[#allocation2 + $0xa0] ss:$16 sps:$4 sm:$0xff]  }
  0x1b   :  { %v1054_v23 = vld [vmem:[#allocation2 + $0xa8] ss:$16 sps:$4 sm:$0xff]   ;;  %v1055_v24 = vld [vmem:[#allocation2 + $0xc4] ss:$16 sps:$4 sm:$0xff]   ;;  %v1057_v25 = vld [vmem:[#allocation2 + $0xcc] ss:$16 sps:$4 sm:$0xff]  }
  0x1c   :  { %v1059_v26 = vld [vmem:[#allocation2 + $0xc0] ss:$16 sps:$4 sm:$0xff]   ;;  %v1060_v27 = vld [vmem:[#allocation2 + $0xc8] ss:$16 sps:$4 sm:$0xff]   ;;  %v1061_v28 = vld [vmem:[#allocation2 + $0xe4] ss:$16 sps:$4 sm:$0xff]  }
  0x1d   :  { %455 = vmatpush1.bf16.msra.mxu0 %v1035_v10  ;;  %496 = vmatpush1.bf16.msra.mxu1 %v1036_v11  ;;  %v1063_v29 = vld [vmem:[#allocation2 + $0xec] ss:$16 sps:$4 sm:$0xff]   ;;  %v1065_v30 = vld [vmem:[#allocation2 + $0xe0] ss:$16 sps:$4 sm:$0xff]   ;;  %v1066_v31 = vld [vmem:[#allocation2 + $0xe8] ss:$16 sps:$4 sm:$0xff]  }
  0x1e   :  { %456 = vmatprep.subr.bf16.mxu0 %v1037_v12  ;;  %497 = vmatprep.subr.bf16.mxu1 %v1039_v13  ;;  %v1067_v32 = vld [vmem:[#allocation2 + $0x104] ss:$16 sps:$4 sm:$0xff]   ;;  %v1069_v33 = vld [vmem:[#allocation2 + $0x10c] ss:$16 sps:$4 sm:$0xff]   ;;  %v1071_v34 = vld [vmem:[#allocation2 + $0x100] ss:$16 sps:$4 sm:$0xff]   ;;  %v107_v12 = vlaneseq }
  0x1f   :  { %v1072_v35 = vld [vmem:[#allocation2 + $0x108] ss:$16 sps:$4 sm:$0xff]   ;;  %v1073_v36 = vld [vmem:[#allocation2 + $0x124] ss:$16 sps:$4 sm:$0xff]   ;;  %v1075_v37 = vld [vmem:[#allocation2 + $0x12c] ss:$16 sps:$4 sm:$0xff]  }
  0x20   :  { %v1077_v38 = vld [vmem:[#allocation2 + $0x120] ss:$16 sps:$4 sm:$0xff]   ;;  %v1078_v39 = vld [vmem:[#allocation2 + $0x128] ss:$16 sps:$4 sm:$0xff]   ;;  %v1079_v40 = vld [vmem:[#allocation2 + $0x144] ss:$16 sps:$4 sm:$0xff]  }
  0x21   :  { %457 = vmatpush1.bf16.msra.mxu0 %v1041_v14  ;;  %498 = vmatpush1.bf16.msra.mxu1 %v1042_v15  ;;  %v1081_v41 = vld [vmem:[#allocation2 + $0x14c] ss:$16 sps:$4 sm:$0xff]   ;;  %v1083_v42 = vld [vmem:[#allocation2 + $0x140] ss:$16 sps:$4 sm:$0xff]   ;;  %v1084_v43 = vld [vmem:[#allocation2 + $0x148] ss:$16 sps:$4 sm:$0xff]  }
  0x22   :  { %458 = vmatprep.subr.bf16.mxu0 %v1043_v16  ;;  %499 = vmatprep.subr.bf16.mxu1 %v1045_v17  ;;  %v1085_v44 = vld [vmem:[#allocation2 + $0x164] ss:$16 sps:$4 sm:$0xff]   ;;  %v1087_v45 = vld [vmem:[#allocation2 + $0x16c] ss:$16 sps:$4 sm:$0xff]   ;;  %v1089_v46 = vld [vmem:[#allocation2 + $0x160] ss:$16 sps:$4 sm:$0xff]  }
  0x23   :  { %v36_v47 = vld [vmem:[%s1351_s1] sm:$0xff]  ;;  %v1090_v48 = vld [vmem:[#allocation2 + $0x168] ss:$16 sps:$4 sm:$0xff]   ;;  %v1093_v51 = vld [vmem:[#allocation2 + $0x18c] ss:$16 sps:$4 sm:$0xff]   ;;  %v1220_v4 = vmov 0.0  }
  0x24   :  { %v895_v49 = vcombine.high %v36_v47, %v36_v47  ;;  %v1091_v50 = vld [vmem:[#allocation2 + $0x184] ss:$16 sps:$4 sm:$0xff]   ;;  %v1095_v52 = vld [vmem:[#allocation2 + $0x180] ss:$16 sps:$4 sm:$0xff]   ;;  %v1096_v53 = vld [vmem:[#allocation2 + $0x188] ss:$16 sps:$4 sm:$0xff]   ;;  %v894_v2 = vcombine.low %v36_v47, %v36_v47 }
  0x25   :  { %459 = vmatpush1.bf16.msra.mxu0 %v1047_v18  ;;  %500 = vmatpush1.bf16.msra.mxu1 %v1048_v19  ;;  %v1097_v54 = vld [vmem:[#allocation2 + $0x1a4] ss:$16 sps:$4 sm:$0xff]   ;;  %v1099_v55 = vld [vmem:[#allocation2 + $0x1ac] ss:$16 sps:$4 sm:$0xff]   ;;  %v1101_v56 = vld [vmem:[#allocation2 + $0x1a0] ss:$16 sps:$4 sm:$0xff]  }
  0x26   :  { %460 = vmatprep.subr.bf16.mxu0 %v1049_v20  ;;  %501 = vmatprep.subr.bf16.mxu1 %v1051_v21  ;;  %v1102_v57 = vld [vmem:[#allocation2 + $0x1a8] ss:$16 sps:$4 sm:$0xff]   ;;  %v1103_v58 = vld [vmem:[#allocation2 + $0x1c4] ss:$16 sps:$4 sm:$0xff]   ;;  %v1105_v59 = vld [vmem:[#allocation2 + $0x1cc] ss:$16 sps:$4 sm:$0xff]  }
  0x27   :  { %482 = vmatprep.mubr.bf16.mxu0 %v895_v49  ;;  %523 = vmatprep.mubr.bf16.mxu1 %v895_v49  ;;  %v1107_v60 = vld [vmem:[#allocation2 + $0x1c0] ss:$16 sps:$4 sm:$0xff]   ;;  %v1108_v61 = vld [vmem:[#allocation2 + $0x1c8] ss:$16 sps:$4 sm:$0xff]   ;;  %v1109_v62 = vld [vmem:[#allocation2 + $0x1e4] ss:$16 sps:$4 sm:$0xff]  }
  0x28   :  { %v1111_v63 = vld [vmem:[#allocation2 + $0x1ec] ss:$16 sps:$4 sm:$0xff]   ;;  %v1113_v0 = vld [vmem:[#allocation2 + $0x1e0] ss:$16 sps:$4 sm:$0xff]   ;;  %v1114_v1 = vld [vmem:[#allocation2 + $0x1e8] ss:$16 sps:$4 sm:$0xff]  }
  0x29   :  { %461 = vmatpush1.bf16.msra.mxu0 %v1053_v22  ;;  %502 = vmatpush1.bf16.msra.mxu1 %v1054_v23  ;;  %v1117_v3 = vld [vmem:[%s1353_s3] sm:$0xff]   ;;  %v1118_v5 = vld [vmem:[%s1353_s3 + $0x8] sm:$0xff]   ;;  %v1119_v6 = vld [vmem:[%s1353_s3 + $0x10] sm:$0xff]   ;;  %vm1221_vm0 = vmmov 0   ;;  %v108_v13 = vshrl.u32 %v107_v12, 7  ;;  %vm722_vm1 = vcmask 261120  }
  0x2a   :  { %462 = vmatprep.subr.bf16.mxu0 %v1055_v24  ;;  %503 = vmatprep.subr.bf16.mxu1 %v1057_v25  ;;  %v1120_v7 = vld [vmem:[%s1353_s3 + $0x18] sm:$0xff]   ;;  %v1121_v8 = vld [vmem:[%s1353_s3 + $0x20] sm:$0xff]   ;;  %v1122_v9 = vld [vmem:[%s1353_s3 + $0x28] sm:$0xff]  }
  0x2b   :  { %v1123_v10 = vld [vmem:[%s1353_s3 + $0x30] sm:$0xff]   ;;  %v1124_v11 = vld [vmem:[%s1353_s3 + $0x38] sm:$0xff]   ;;  %v101_v14 = vld [vmem:[#allocation2 + $0x200] sm:$0x11]  ;;  %v109_v17 = vsub.s32 0, %v108_v13 }
  0x2c   :  { %v102_v15 = vld [vmem:[#allocation2 + $0x208] sm:$0x11]  ;;  %v103_v16 = vunpack.c.l.bf16 %v101_v14  ;;  %v104_v19 = vunpack.c.h.bf16 %v101_v14  ;;  %v552_v47 = vld [vmem:[%s1353_s3 + $0x40] sm:$0x1] }
  0x2d   :  { %463 = vmatpush1.bf16.msra.mxu0 %v1059_v26  ;;  %504 = vmatpush1.bf16.msra.mxu1 %v1060_v27  ;;  %v105_v18 = vunpack.c.l.bf16 %v102_v15  ;;  %v106_v20 = vunpack.c.h.bf16 %v102_v15 }
  0x2e   :  { %464 = vmatprep.subr.bf16.mxu0 %v1061_v28  ;;  %505 = vmatprep.subr.bf16.mxu1 %v1063_v29  ;;  %v110_v21 = vrot.slane %v103_v16, %v109_v17  ;;  %v114_v23 = vrot.slane %v104_v19, %v109_v17 }
  0x2f   :  { %v118_v22 = vrot.slane %v105_v18, %v109_v17  ;;  %v122_v24 = vrot.slane %v106_v20, %v109_v17 }
  0x31   :  { %465 = vmatpush1.bf16.msra.mxu0 %v1065_v30  ;;  %506 = vmatpush1.bf16.msra.mxu1 %v1066_v31 }
  0x32   :  { %466 = vmatprep.subr.bf16.mxu0 %v1067_v32  ;;  %507 = vmatprep.subr.bf16.mxu1 %v1069_v33 }
  0x35   :  { %467 = vmatpush1.bf16.msra.mxu0 %v1071_v34  ;;  %508 = vmatpush1.bf16.msra.mxu1 %v1072_v35 }
  0x36   :  { %468 = vmatprep.subr.bf16.mxu0 %v1073_v36  ;;  %509 = vmatprep.subr.bf16.mxu1 %v1075_v37 }
  0x39   :  { %469 = vmatpush1.bf16.msra.mxu0 %v1077_v38  ;;  %510 = vmatpush1.bf16.msra.mxu1 %v1078_v39 }
  0x3a   :  { %470 = vmatprep.subr.bf16.mxu0 %v1079_v40  ;;  %511 = vmatprep.subr.bf16.mxu1 %v1081_v41  ;;  %v1127_v41 = vld [vmem:[%s1354_s4 + $0x4] ss:$24 sps:$4 sm:$0xff]  }
  0x3d   :  { %471 = vmatpush1.bf16.msra.mxu0 %v1083_v42  ;;  %512 = vmatpush1.bf16.msra.mxu1 %v1084_v43  ;;  %v1125_v42 = vld [vmem:[%s1354_s4] ss:$24 sps:$4 sm:$0xff]   ;;  %v1130_v43 = vld [vmem:[%s1354_s4 + $0x34] ss:$24 sps:$4 sm:$0xff]  }
  0x3e   :  { %472 = vmatprep.subr.bf16.mxu0 %v1085_v44  ;;  %513 = vmatprep.subr.bf16.mxu1 %v1087_v45  ;;  %v1128_v44 = vld [vmem:[%s1354_s4 + $0x30] ss:$24 sps:$4 sm:$0xff]   ;;  %v1133_v45 = vld [vmem:[%s1354_s4 + $0xc] ss:$24 sps:$4 sm:$0xff]  }
  0x41   :  { %473 = vmatpush1.bf16.msra.mxu0 %v1089_v46  ;;  %514 = vmatpush1.bf16.msra.mxu1 %v1090_v48  ;;  %v1222_v46 = vmov 0   ;;  %v553_v48 = vunpack.c.l.bf16 %v552_v47 }
  0x42   :  { %474 = vmatprep.subr.bf16.mxu0 %v1091_v50  ;;  %515 = vmatprep.subr.bf16.mxu1 %v1093_v51 }
  0x43   :  { %v557_v49 = vrot.slane %v553_v48, %v109_v17 }
  0x45   :  { %475 = vmatpush1.bf16.msra.mxu0 %v1095_v52  ;;  %516 = vmatpush1.bf16.msra.mxu1 %v1096_v53 }
  0x46   :  { %476 = vmatprep.subr.bf16.mxu0 %v1097_v54  ;;  %517 = vmatprep.subr.bf16.mxu1 %v1099_v55  ;;  %v647_v55 = vld [vmem:[%s1350_s0] sm:$0xff] }
  0x49   :  { %477 = vmatpush1.bf16.msra.mxu0 %v1101_v56  ;;  %518 = vmatpush1.bf16.msra.mxu1 %v1102_v57 }
  0x4a   :  { %478 = vmatprep.subr.bf16.mxu0 %v1103_v58  ;;  %519 = vmatprep.subr.bf16.mxu1 %v1105_v59  ;;  %v1131_v58 = vld [vmem:[%s1354_s4 + $0x8] ss:$24 sps:$4 sm:$0xff]  }
  0x4d   :  { %479 = vmatpush1.bf16.msra.mxu0 %v1107_v60  ;;  %520 = vmatpush1.bf16.msra.mxu1 %v1108_v61  ;;  %v1136_v60 = vld [vmem:[%s1354_s4 + $0x3c] ss:$24 sps:$4 sm:$0xff]   ;;  %v1134_v61 = vld [vmem:[%s1354_s4 + $0x38] ss:$24 sps:$4 sm:$0xff]  }
  0x4e   :  { %480 = vmatprep.subr.bf16.mxu0 %v1109_v62  ;;  %521 = vmatprep.subr.bf16.mxu1 %v1111_v63  ;;  %v1139_v62 = vld [vmem:[%s1354_s4 + $0x14] ss:$24 sps:$4 sm:$0xff]   ;;  %v1137_v63 = vld [vmem:[%s1354_s4 + $0x10] ss:$24 sps:$4 sm:$0xff]  }
  0x51   :  { %481 = vmatpush1.bf16.msra.mxu0 %v1113_v0  ;;  %522 = vmatpush1.bf16.msra.mxu1 %v1114_v1  ;;  %v1142_v0 = vld [vmem:[%s1354_s4 + $0x44] ss:$24 sps:$4 sm:$0xff]   ;;  %v1140_v1 = vld [vmem:[%s1354_s4 + $0x40] ss:$24 sps:$4 sm:$0xff]   ;;  %s1223_s4 = smov [#allocation5]  }
  0x52   :  { %992 = vmatprep.subr.bf16.mxu0 %v1220_v4  ;;  %726 = vmatprep.subr.bf16.mxu1 %v1127_v41  ;;  %s885_s22 = sshll.u32 %s1223_s4, 4  ;;  %s886_s22 = int_to_ptr.vmem [resolvable:$true] %s885_s22 }
  0x53   :  { %s1191_s23 = scalar_lea.vmem %s886_s22, 256  ;;  %p1196_p9 = scmp.lt.s32.totalorder %s886_s22, %s886_s22 }
  0x54   :  { %483 = vmatmul.mubr.bf16.vlgmr.msra.gmra.mrb[0].mxu0 %v894_v2  ;;  %524 = vmatmul.mubr.bf16.vlgmr.msra.gmra.mrb[0].mxu1 %v894_v2  ;;  %p1192_p8 = scmp.ne.s32.totalorder %s886_s22, %s1191_s23  ;;  %p1197_p10 = scmp.lt.s32.totalorder %s1191_s23, %s1191_s23 }
  0x55   :  { %993 = vmatpush3.bf16.msra.mxu0 %v1117_v3  ;;  %1008 = vmatprep.mubr.msk.bf16.mxu0 %vm1221_vm0, %v1220_v4 }
  0x56   :  { %994 = vmatprep.subr.bf16.mxu0 %v1220_v4  ;;  %727 = vmatpush1.bf16.msra.mxu1 %v1125_v42  ;;  %p1198_p11 = por %p1197_p10, %p1196_p9 }
  0x57   :  { %728 = vmatprep.subr.bf16.mxu1 %v1130_v43  ;;  %758 = vmatprep.mubr.bf16.mxu1 %v1222_v46 }
  0x58   :  { %p1199_p12 = pnand %p1198_p11, %p1192_p8 }
  0x59   :  { %995 = vmatpush3.bf16.msra.mxu0 %v1118_v5 }
  0x5a   :  { %996 = vmatprep.subr.bf16.mxu0 %v1220_v4  ;;  %729 = vmatpush1.bf16.msra.mxu1 %v1128_v44 }
  0x5b   :  { %767 = vmatprep.subr.bf16.mxu1 %v1133_v45 }
  0x5d   :  { %997 = vmatpush3.bf16.msra.mxu0 %v1119_v6 }
  0x5e   :  { %998 = vmatprep.subr.bf16.mxu0 %v1220_v4 }
  0x61   :  { %999 = vmatpush3.bf16.msra.mxu0 %v1120_v7 }
  0x62   :  { %1000 = vmatprep.subr.bf16.mxu0 %v1220_v4 }
  0x65   :  { %1001 = vmatpush3.bf16.msra.mxu0 %v1121_v8 }
  0x66   :  { %1002 = vmatprep.subr.bf16.mxu0 %v1220_v4 }
  0x69   :  { %1003 = vmatpush3.bf16.msra.mxu0 %v1122_v9 }
  0x6a   :  { %1004 = vmatprep.subr.bf16.mxu0 %v1220_v4 }
  0x6d   :  { %1005 = vmatpush3.bf16.msra.mxu0 %v1123_v10 }
  0x6e   :  { %1006 = vmatprep.subr.bf16.mxu0 %v1220_v4 }
  0x71   :  { %1007 = vmatpush3.bf16.msra.mxu0 %v1124_v11 }
 0x127   :  { %v484_v25 = vpop.f32.mrb[0].mxu0  ;;  %v525_v26 = vpop.f32.mrb[0].mxu1 }
 0x128   :  { %v485_v27 = vadd.f32 %v484_v25, %v110_v21  ;;  %v526_v28 = vadd.f32 %v525_v26, %v118_v22  ;;  %v486_v29 = vpop.f32.mrb[1].mxu0  ;;  %v527_v30 = vpop.f32.mrb[1].mxu1 }
 0x129   :  { %v487_v31 = vadd.f32 %v486_v29, %v114_v23  ;;  %v528_v32 = vadd.f32 %v527_v30, %v122_v24  ;;  %v488_v33 = vpop.f32.mrb[2].mxu0  ;;  %v529_v34 = vpop.f32.mrb[2].mxu1 }
 0x12a   :  { %v489_v35 = vpop.f32.mrb[3].mxu0  ;;  %v530_v36 = vpop.f32.mrb[3].mxu1 }
 0x12b   :  { %v532_v37 = vmax.f32 %v485_v27, %v487_v31  ;;  %v533_v38 = vmax.f32 %v526_v28, %v528_v32 }
 0x12d   :  { %v534_v39 = vmax.f32 %v532_v37, %v533_v38 }
 0x12f   :  { %v535_v40 = vpack.c.bf16 %v534_v39, %v534_v39 }
 0x131   :  { %1009 = vmatmul.mubr.bf16.vlgmr.msra.gmra.mrb[4].mxu0 %v535_v40 }
 0x204   :  { %v640_v50 = vpop.f32.mrb[4].mxu0 }
 0x205   :  { %v641_v51 = vadd.f32 %v640_v50, %v557_v49  ;;  %v1010_v52 = vpop.f32.mrb[5].mxu0 }
 0x206   :  { %v643_v53 = vpop.f32.mrb[6].mxu0 }
 0x207   :  { %1143 = vtanh.f32 %v641_v51  ;;  %v1011_v54 = vpop.f32.mrb[7].mxu0 }
 0x211   :  { %v1144_v56 = vpop.eup %1143 }
 0x212   :  { %v648_v57 = vadd.f32 %v1144_v56, %v647_v55 }
 0x214   :  { %v649_v59 = vpack.c.bf16 %v648_v57, %v648_v57 }
 0x216   :  { %980 = vmatmul.mubr.msk.bf16.vlgmr.msra.gmra.mrb[4].mxu1 %vm722_vm1, %v649_v59 }
 0x217   :  { %768 = vmatpush1.bf16.msra.mxu1 %v1131_v58  ;;  %799 = vmatprep.mubr.bf16.mxu1 %v1222_v46 }
 0x218   :  { %769 = vmatprep.subr.bf16.mxu1 %v1136_v60 }
 0x21b   :  { %770 = vmatpush1.bf16.msra.mxu1 %v1134_v61 }
 0x21c   :  { %808 = vmatprep.subr.bf16.mxu1 %v1139_v62 }
 0x21e   :  { %981 = vmatmul.mubr.msk.bf16.vlgmr.msra.gmra.mrb[8].mxu1 %vm722_vm1, %v649_v59 }
 0x21f   :  { %809 = vmatpush1.bf16.msra.mxu1 %v1137_v63  ;;  %840 = vmatprep.mubr.bf16.mxu1 %v1222_v46 }
 0x220   :  { %810 = vmatprep.subr.bf16.mxu1 %v1142_v0 }
 0x223   :  { %811 = vmatpush1.bf16.msra.mxu1 %v1140_v1 }
 0x226   :  { %982 = vmatmul.mubr.msk.bf16.vlgmr.msra.gmra.mrb[12].mxu1 %vm722_vm1, %v649_v59 }
 0x2e9   :  { %v760_v2 = vpop.f32.mrb[4].mxu1 }
 0x2ea   :  { %v849_v3 = vsub.f32 0.0, %v760_v2  ;;  %v762_v4 = vpop.f32.mrb[5].mxu1 }
 0x2eb   :  { %v850_v5 = vsub.f32 0.0, %v762_v4  ;;  %v764_v6 = vpop.f32.mrb[6].mxu1 }
 0x2ec   :  { %v851_v7 = vmul.f32 1.442695, %v849_v3  ;;  %v765_v8 = vpop.f32.mrb[7].mxu1 }
 0x2ed   :  { %v853_v9 = vmul.f32 1.442695, %v850_v5 }
 0x2ee   :  { %1145 = vpow2.f32 %v851_v7 }
 0x2ef   :  { %1147 = vpow2.f32 %v853_v9 }
 0x2f1   :  { %v801_v10 = vpop.f32.mrb[8].mxu1 }
 0x2f2   :  { %v803_v11 = vpop.f32.mrb[9].mxu1  ;;  %1149 = vtanh.f32 %v801_v10 }
 0x2f3   :  { %v805_v12 = vpop.f32.mrb[10].mxu1  ;;  %1151 = vtanh.f32 %v803_v11 }
 0x2f4   :  { %v806_v13 = vpop.f32.mrb[11].mxu1 }
 0x2f8   :  { %v1146_v14 = vpop.eup %1145 }
 0x2f9   :  { %v1148_v15 = vpop.eup %1147  ;;  %v855_v16 = vadd.f32 1.0, %v1146_v14  ;;  %v842_v17 = vpop.f32.mrb[12].mxu1 }
 0x2fa   :  { %v856_v18 = vadd.f32 1.0, %v1148_v15  ;;  %v861_v19 = vsub.f32 0.0, %v842_v17  ;;  %v844_v20 = vpop.f32.mrb[13].mxu1 }
 0x2fb   :  { %1153 = vrcp.f32 %v855_v16  ;;  %v862_v21 = vsub.f32 0.0, %v844_v20  ;;  %v846_v22 = vpop.f32.mrb[14].mxu1 }
 0x2fc   :  { %1155 = vrcp.f32 %v856_v18  ;;  %v863_v23 = vmul.f32 1.442695, %v861_v19  ;;  %v847_v24 = vpop.f32.mrb[15].mxu1  ;;  %v1150_v26 = vpop.eup %1149 }
 0x2fd   :  { %v865_v25 = vmul.f32 1.442695, %v862_v21  ;;  %v1152_v27 = vpop.eup %1151 }
 0x2fe   :  { %1157 = vpow2.f32 %v863_v23 }
 0x2ff   :  { %1159 = vpow2.f32 %v865_v25 }
 0x305   :  { %v1154_v28 = vpop.eup %1153 }
 0x306   :  { %v1156_v29 = vpop.eup %1155  ;;  %v871_v30 = vmul.f32 %v1154_v28, %v1150_v26 }
 0x307   :  { %v872_v31 = vmul.f32 %v1156_v29, %v1152_v27 }
 0x308   :  { %v1158_v32 = vpop.eup %1157  ;;  %1161 = vtanh.f32 %v871_v30 }
 0x309   :  { %v1160_v33 = vpop.eup %1159  ;;  %v867_v34 = vadd.f32 1.0, %v1158_v32  ;;  %1163 = vtanh.f32 %v872_v31 }
 0x30a   :  { %v868_v35 = vadd.f32 1.0, %v1160_v33 }
 0x30b   :  { %1165 = vrcp.f32 %v867_v34 }
 0x30c   :  { %1167 = vrcp.f32 %v868_v35 }
 0x312   :  { %v1162_v36 = vpop.eup %1161 }
 0x313   :  { %v1164_v37 = vpop.eup %1163 }
 0x315   :  { %v1166_v38 = vpop.eup %1165 }
 0x316   :  { %v1168_v39 = vpop.eup %1167  ;;  %v875_v40 = vmul.f32 %v1166_v38, %v1162_v36 }
 0x317   :  { %v876_v41 = vmul.f32 %v1168_v39, %v1164_v37 }
 0x318   :  { %877 = vst [vmem:[#allocation5] sm:$0xff] %v875_v40 }
 0x319   :  { %878 = vst [vmem:[#allocation5 + $0x8] sm:$0xff] %v876_v41 }
 0x31a   :  { %1202 = shalt.err (!%p1199_p12)
}
 0x31b   :  { %s1203_s26 = scalar_lea.hbm %s1355_s5, 256 }
 0x31c   :  { %p1204_p13 = scmp.ne.s32.totalorder %s1355_s5, %s1203_s26  ;;  %p1207_p0 = scmp.lt.u32.totalorder %s1203_s26, %s1355_s5 }
 0x31e   :  { %p1209_p1 = pnand %p1207_p0, %p1204_p13 }
 0x320   :  { %1212 = shalt.err (!%p1209_p1)
}
 0x321   :  { %888 = dma.vmem_to_hbm [thread:$0]  %s886_s22, 256, %s1355_s5, [#allocation4]  }
 0x322   :  { %1215 = dma.done.wait [#allocation4], 256  }
 0x323   :  { %1216 = vsyncadd [#allocation4], 4294967040 }
 0x324   :  { %892 = vsyncpa [#allocation3], 1 }
 0x325   :  { %893 = vsyncpa [#allocation4], 1 }

</bundles_post_ra>
